<compile_context>
chip_gen: v6e
topology: v6e:2x2x1
jax: 0.10.0
libtpu: 0.0.40
codegen_flags: <defaults>
</compile_context>

<pallas_src>
import math

import jax
import jax.numpy as jnp
from jax.experimental import pallas as pl
from jax.experimental.pallas import tpu as pltpu


# ----------------------------------------------------------------------------
# Generation-aware VMEM budgeting.
# ----------------------------------------------------------------------------
def _vmem_limit_bytes():
    """Scoped-VMEM limit for the feature-streaming kernels.

    v7x has 64 MiB physical VMEM per TensorCore -> keep the pipelined
    footprint at ~3/4 of that (~48 MiB).  v5e/v6e have 128 MiB -> allow up to
    64 MiB (on v5e the explicit limit also matters because its default scoped
    limit is only 16 MiB).
    """
    cap = 128 * 1024 * 1024
    try:
        cap = int(getattr(pltpu.get_tpu_info(), "vmem_capacity_bytes", cap))
    except Exception:  # no TPU backend yet / interpret mode / API drift
        pass
    return min(64 * 1024 * 1024, (cap * 3) // 4)


_VMEM_LIMIT = _vmem_limit_bytes()

# Per-input HBM->VMEM block budget for the pipelined feature stream:
#   (limit - headroom for resident accumulator/output blocks) / 2 buffers,
# clamped to the 4-8 MiB range where mem-bound kernels sit near the HBM
# roofline (tiny tiles pay ~0.35 us/step fixed overhead and undershoot BW).
_BLOCK_BUDGET = max(2 * 1024 * 1024,
                    min(8 * 1024 * 1024, (_VMEM_LIMIT - 8 * 1024 * 1024) // 2))


# ----------------------------------------------------------------------------
# Tiling helpers.
# ----------------------------------------------------------------------------
def _sublane_align(dtype):
    """Sublane tile for the second-to-last block dim (8 f32, 16 bf16, 32 i8)."""
    return max(8, 32 // jnp.dtype(dtype).itemsize)


def _pick_tn(n):
    """N-axis tile.

    Must satisfy the (8, 128) block rule on the 2-D (N, C)/(N, HW) output
    blocks: tn % 8 == 0 or tn == N.  Prefer >= 2 grid steps along the
    "parallel" N axis so both v7x TensorCores get work — possible whenever
    8 | N and N >= 16 (typical training batches); otherwise fall back to the
    full batch in one tile.
    """
    if n >= 16 and n % 8 == 0:
        return 8
    return n


def _pick_tc(c, max_tc, align):
    """Largest legal C tile <= max_tc: a multiple of `align` dividing C, or C."""
    if c <= max_tc:
        return c
    t = (min(max_tc, c) // align) * align
    while t >= align:
        if c % t == 0:
            return t
        t -= align
    return None


def _feature_tiles(n, c, hw, dtype, budget_bytes=None):
    """Pick (tn, tc) so one (tn, tc, HW) input block is ~<= budget_bytes."""
    if budget_bytes is None:
        budget_bytes = _BLOCK_BUDGET
    itemsize = jnp.dtype(dtype).itemsize
    align = _sublane_align(dtype)
    tn = _pick_tn(n)
    max_tc = max(1, budget_bytes // max(1, tn * hw * itemsize))
    tc = _pick_tc(c, max_tc, align)
    if tc is None:
        # No aligned divisor of C fits the budget: take the smallest legal C
        # tile instead of silently reverting to the full C (the old bug).
        # TODO(synk): for extremely large spatial maps also tile HW in
        # multiples of 128 (adds a second reduction axis for the pooled mean);
        # not needed for realistic CNN feature-map sizes.
        tc = align if c % align == 0 else c
    return tn, tc


# ----------------------------------------------------------------------------
# Kernel 1: single pipelined pass over features.
#   pooled[n, c]        = mean_hw features[n, c, hw]
#   spatial_mean[n, hw] = sum_c features[n, c, hw] * gcm[n, c]
# gcm (= grad_channel_mean, analytic) is a tiny (N, C) f32 input.
# spatial_mean is accumulated over the C grid axis into a resident output
# block ("arbitrary" reduction axis, zeroed at the first C step).
# ----------------------------------------------------------------------------
def _rsc_stats_kernel(f_ref, gcm_ref, pooled_ref, sm_ref):
    # Single upcast of the block, reused by both reductions (no-op for f32).
    f = f_ref[...].astype(jnp.float32)                       # (tn, tc, HW)
    gcm = gcm_ref[...]                                       # (tn, tc) f32
    pooled_ref[...] = jnp.mean(f, axis=-1)                   # (tn, tc)

    @pl.when(pl.program_id(1) == 0)
    def _():
        sm_ref[...] = jnp.zeros_like(sm_ref)

    # HBM-bound kernel: VPU multiply + sublane reduce.  (An MXU offload of the
    # C contraction would only matter if v7x profiling shows a VALU-bound flip;
    # with tn <= 8 the MXU matvec would run at tiny occupancy anyway.)
    sm_ref[...] += jnp.sum(f * gcm[:, :, None], axis=1)      # (tn, HW)


def rsc_stats(features_nchw, gcm):
    n, c, h, w = features_nchw.shape
    hw = h * w
    # TODO(synk): for HW < 128, repack channel groups into the lane axis
    # ((N, C/g, g*HW)) to recover lane/DMA-burst occupancy for tiny maps.
    f = features_nchw.reshape(n, c, hw)   # keep input dtype (bf16 passes through)
    tn, tc = _feature_tiles(n, c, hw, f.dtype)
    grid = (n // tn, c // tc)
    return pl.pallas_call(
        _rsc_stats_kernel,
        out_shape=(jax.ShapeDtypeStruct((n, c), jnp.float32),    # pooled_full
                   jax.ShapeDtypeStruct((n, hw), jnp.float32)),  # spatial_mean
        grid_spec=pltpu.PrefetchScalarGridSpec(
            num_scalar_prefetch=0,
            grid=grid,
            # pipeline_mode=pl.Buffered(3) on the feature spec would be the
            # next knob if profiling showed exposed DMA; 2-deep is the default.
            in_specs=[pl.BlockSpec((tn, tc, hw), lambda i, k: (i, k, 0)),
                      pl.BlockSpec((tn, tc), lambda i, k: (i, k))],
            out_specs=(pl.BlockSpec((tn, tc), lambda i, k: (i, k)),
                       pl.BlockSpec((tn, hw), lambda i, k: (i, 0)))),
        compiler_params=pltpu.CompilerParams(
            dimension_semantics=("parallel", "arbitrary"),
            vmem_limit_bytes=_VMEM_LIMIT),
    )(f, gcm.astype(jnp.float32))


# ----------------------------------------------------------------------------
# Kernel 2: spatial-masked GAP.  mask is (N, 1, HW); broadcast happens inside
# the kernel, so no feature-sized mask is ever written to / read from HBM.
#   pooled_masked[n, c] = (1/HW) * sum_hw features[n, c, hw] * mask[n, hw]
# ----------------------------------------------------------------------------
def _masked_pool_kernel(f_ref, m_ref, out_ref):
    f = f_ref[...].astype(jnp.float32)                        # (tn, tc, HW)
    m = m_ref[...]                                            # (tn, 1,  HW) f32
    out_ref[...] = jnp.sum(f * m, axis=-1) * (1.0 / f.shape[-1])


def spatial_masked_pool(features_nchw, mask_n1hw):
    n, c, h, w = features_nchw.shape
    hw = h * w
    f = features_nchw.reshape(n, c, hw)
    tn, tc = _feature_tiles(n, c, hw, f.dtype)
    grid = (n // tn, c // tc)
    return pl.pallas_call(
        _masked_pool_kernel,
        out_shape=jax.ShapeDtypeStruct((n, c), jnp.float32),
        grid_spec=pltpu.PrefetchScalarGridSpec(
            num_scalar_prefetch=0,
            grid=grid,
            in_specs=[pl.BlockSpec((tn, tc, hw), lambda i, k: (i, k, 0)),
                      pl.BlockSpec((tn, 1, hw), lambda i, k: (i, 0, 0))],
            out_specs=pl.BlockSpec((tn, tc), lambda i, k: (i, k))),
        compiler_params=pltpu.CompilerParams(
            dimension_semantics=("parallel", "parallel"),
            vmem_limit_bytes=_VMEM_LIMIT),
    )(f, mask_n1hw.astype(jnp.float32))


# ----------------------------------------------------------------------------
# RSCLoss module (JAX / Pallas version).
# ----------------------------------------------------------------------------
class RSCLoss:
    """Representation Self-Challenging Loss (Pallas TPU)."""

    def __init__(self, drop_f, drop_b, num_channels, num_classes, key):
        self.drop_f = drop_f
        self.drop_b = drop_b
        # Synthetic classifier parameters: GAP + Linear(C -> K), deterministic.
        scale = 1.0 / math.sqrt(num_channels)
        self.W = jax.random.uniform(
            key, (num_classes, num_channels),
            minval=-scale, maxval=scale).astype(jnp.float32)
        self.Wt = self.W.T            # stored once; used by every matmul below
        self.b = jnp.zeros((num_classes,), jnp.float32)

    # Plain-JAX classifier (GAP + Linear) used to produce `preds` in the demo.
    def classifier_ref(self, f_nchw):
        pooled = jnp.mean(f_nchw.astype(jnp.float32), axis=(2, 3))
        return pooled @ self.Wt + self.b

    def __call__(self, features, preds, labels, oh_labels, choose_one):
        del oh_labels  # the reference forward rebuilds its own one-hot
        percent = self.drop_b
        n, c, h, w = features.shape
        hw = h * w
        class_num = preds.shape[1]
        one_hot_lbl = jax.nn.one_hot(labels, class_num, dtype=jnp.float32)

        # Analytic gradient of sum(preds * one_hot) wrt features through the
        # GAP + Linear classifier:  grads[n,c,h,w] = W[label_n, c] / HW, so
        # grad_channel_mean = (one_hot @ W) / HW exactly — no feature-sized
        # autograd pass and no grads stream in the stats kernel.
        grad_channel_mean = (one_hot_lbl @ self.W) / float(hw)      # (N, C)

        # Single pipelined pass over the features.
        pooled_full, spatial_mean = rsc_stats(features, grad_channel_mean)

        # TODO(synk): torch.sort-based threshold selection has no clean Pallas
        # equivalent; done with jnp.sort in plain JAX glue.
        if choose_one <= 4:
            spatial_drop_num = math.ceil(hw * 1 / 3.0)
            sorted_desc = -jnp.sort(-spatial_mean, axis=1)
            th = sorted_desc[:, spatial_drop_num].reshape(n, 1)
            mask_flat = jnp.where(spatial_mean > th, 0.0, 1.0)
            # One extra pass over features; mask stays (N,1,HW), broadcast in-kernel.
            pooled_masked = spatial_masked_pool(features,
                                                mask_flat.reshape(n, 1, hw))
        else:
            vector_thresh_percent = math.ceil(c * 1 / 3.2)
            sorted_desc = -jnp.sort(-grad_channel_mean, axis=1)
            th = sorted_desc[:, vector_thresh_percent].reshape(n, 1)
            vector = jnp.where(grad_channel_mean > th, 0.0, 1.0)
            # Channel mask: masked GAP == unmasked GAP * mask (no feature re-read).
            pooled_masked = pooled_full * vector

        # ---- Epilogue on tiny (N,C)/(N,K) tensors: plain JAX per the perf
        # review (extra Pallas launches here only add fixed overhead). ----
        p_before = jnp.sum(jax.nn.softmax(preds.astype(jnp.float32), axis=1)
                           * one_hot_lbl, axis=1)
        logits_after = pooled_masked @ self.Wt + self.b
        p_after = jnp.sum(jax.nn.softmax(logits_after, axis=1)
                          * one_hot_lbl, axis=1)
        change_vector = jnp.maximum(p_before - p_after - 0.0001, 0.0)

        # Clamp to avoid silent out-of-bounds gather (JAX clamps, torch errors).
        th_idx = min(int(round(float(n) * percent)), n - 1)
        th_fg_value = (-jnp.sort(-change_vector))[th_idx]
        keep = jnp.where(change_vector > th_fg_value, 0.0, 1.0).reshape(n, 1)

        # Per-sample mask reset (keep => unmasked pooled), classifier, CE.
        pooled_final = keep * pooled_full + (1.0 - keep) * pooled_masked
        logits = pooled_final @ self.Wt + self.b
        lse = jax.nn.logsumexp(logits, axis=1)
        nll = lse - jnp.sum(one_hot_lbl * logits, axis=1)
        return jnp.mean(nll)


if __name__ == "__main__":
    # Small, deterministic example shapes.
    N, C, H, W = 2, 4, 16, 16
    K = 8  # num classes

    key = jax.random.PRNGKey(0)
    k_feat, k_lbl, k_cls = jax.random.split(key, 3)

    # f32 here; bf16 features pass straight through the wrappers (no forced
    # upcast) and are upcast to f32 inside the kernels.
    features = jax.random.normal(k_feat, (N, C, H, W), dtype=jnp.float32)
    labels = jax.random.randint(k_lbl, (N,), 0, K, dtype=jnp.int32)
    oh_labels = jax.nn.one_hot(labels, K, dtype=jnp.float32)

    rsc = RSCLoss(drop_f=1.0 / 3.0, drop_b=1.0 / 3.0,
                  num_channels=C, num_classes=K, key=k_cls)

    # preds = classifier(features), as the upstream model would produce.
    preds = rsc.classifier_ref(features)

    # --- Lightweight correctness check of the two Pallas kernels vs plain JAX.
    one_hot_lbl = jax.nn.one_hot(labels, K, dtype=jnp.float32)
    gcm = (one_hot_lbl @ rsc.W) / float(H * W)
    pooled_k, sm_k = rsc_stats(features, gcm)
    f_flat = features.reshape(N, C, H * W).astype(jnp.float32)
    pooled_ref = jnp.mean(f_flat, axis=-1)
    sm_ref = jnp.einsum("ncl,nc->nl", f_flat, gcm)
    assert jnp.allclose(pooled_k, pooled_ref, atol=1e-5, rtol=1e-5)
    assert jnp.allclose(sm_k, sm_ref, atol=1e-5, rtol=1e-5)
    mask_demo = (jax.random.uniform(k_feat, (N, 1, H * W)) > 0.5).astype(jnp.float32)
    pm_k = spatial_masked_pool(features, mask_demo)
    pm_ref = jnp.mean(f_flat * mask_demo, axis=-1)
    assert jnp.allclose(pm_k, pm_ref, atol=1e-5, rtol=1e-5)

    # choose_one is a static branch selection (random.randint in the PyTorch
    # reference); exercise both the spatial-mask and channel-mask branches.
    loss_spatial = rsc(features, preds, labels, oh_labels, choose_one=0)
    loss_channel = rsc(features, preds, labels, oh_labels, choose_one=9)
    jax.block_until_ready((loss_spatial, loss_channel))

    assert loss_spatial.shape == () and jnp.isfinite(loss_spatial)
    assert loss_channel.shape == () and jnp.isfinite(loss_channel)
    print("KERNEL_OK")
</pallas_src>

<mosaic_0001>
module attributes {stable_mosaic.version = 11 : i64} {
  func.func @_rsc_stats_kernel(%arg0: i32, %arg1: i32, %arg2: memref<2x4x256xf32, #tpu.memory_space<vmem>>, %arg3: memref<2x4xf32, #tpu.memory_space<vmem>>, %arg4: memref<2x4xf32, #tpu.memory_space<vmem>>, %arg5: memref<2x256xf32, #tpu.memory_space<vmem>>) attributes {dimension_semantics = [#tpu.dimension_semantics<parallel>, #tpu.dimension_semantics<arbitrary>], iteration_bounds = array<i64: 1, 1>, scalar_prefetch = 0 : i64, scratch_operands = 0 : i64, tpu.core_type = #tpu.core_type<tc>, window_params = [{transform_indices = @transform_0, window_bounds = array<i64: 2, 4, 256>}, {transform_indices = @transform_1, window_bounds = array<i64: 2, 4>}, {transform_indices = @transform_2, window_bounds = array<i64: 2, 4>}, {transform_indices = @transform_3, window_bounds = array<i64: 2, 256>}]} {
    %c0 = arith.constant 0 : index
    %c0_0 = arith.constant 0 : index
    %c0_1 = arith.constant 0 : index
    %0 = vector.load %arg2[%c0, %c0_0, %c0_1] : memref<2x4x256xf32, #tpu.memory_space<vmem>>, vector<2x4x256xf32>
    %c0_2 = arith.constant 0 : index
    %c0_3 = arith.constant 0 : index
    %1 = vector.load %arg3[%c0_2, %c0_3] : memref<2x4xf32, #tpu.memory_space<vmem>>, vector<2x4xf32>
    %cst = arith.constant dense<0.000000e+00> : vector<2x4xf32>
    %2 = vector.multi_reduction <add>, %0, %cst [2] : vector<2x4x256xf32> to vector<2x4xf32>
    %cst_4 = arith.constant 2.560000e+02 : f32
    %3 = vector.broadcast %cst_4 : f32 to vector<2x4xf32>
    %4 = arith.divf %2, %3 : vector<2x4xf32>
    %c0_5 = arith.constant 0 : index
    %c0_6 = arith.constant 0 : index
    %5 = vector.load %arg4[%c0_5, %c0_6] : memref<2x4xf32, #tpu.memory_space<vmem>>, vector<2x4xf32>
    tpu.vector_store %arg4[%c0_5, %c0_6], %4 {strides = array<i32>} : memref<2x4xf32, #tpu.memory_space<vmem>>, vector<2x4xf32>,
    %c0_i32 = arith.constant 0 : i32
    %6 = arith.cmpi eq, %arg1, %c0_i32 : i32
    %7 = arith.extui %6 : i1 to i32
    %c0_i32_7 = arith.constant 0 : i32
    %8 = arith.cmpi ne, %7, %c0_i32_7 : i32
    scf.if %8 {
      %cst_13 = arith.constant 0.000000e+00 : f32
      %16 = vector.broadcast %cst_13 : f32 to vector<2x256xf32>
      %c0_14 = arith.constant 0 : index
      %c0_15 = arith.constant 0 : index
      %17 = vector.load %arg5[%c0_14, %c0_15] : memref<2x256xf32, #tpu.memory_space<vmem>>, vector<2x256xf32>
      tpu.vector_store %arg5[%c0_14, %c0_15], %16 {strides = array<i32>} : memref<2x256xf32, #tpu.memory_space<vmem>>, vector<2x256xf32>,
    } else {
    }
    %c0_8 = arith.constant 0 : index
    %c0_9 = arith.constant 0 : index
    %9 = vector.load %arg5[%c0_8, %c0_9] : memref<2x256xf32, #tpu.memory_space<vmem>>, vector<2x256xf32>
    %10 = vector.shape_cast %1 : vector<2x4xf32> to vector<2x4x1xf32>
    %11 = vector.broadcast %10 : vector<2x4x1xf32> to vector<2x4x256xf32>
    %12 = arith.mulf %0, %11 : vector<2x4x256xf32>
    %cst_10 = arith.constant dense<0.000000e+00> : vector<2x256xf32>
    %13 = vector.multi_reduction <add>, %12, %cst_10 [1] : vector<2x4x256xf32> to vector<2x256xf32>
    %14 = arith.addf %9, %13 : vector<2x256xf32>
    %c0_11 = arith.constant 0 : index
    %c0_12 = arith.constant 0 : index
    %15 = vector.load %arg5[%c0_11, %c0_12] : memref<2x256xf32, #tpu.memory_space<vmem>>, vector<2x256xf32>
    tpu.vector_store %arg5[%c0_11, %c0_12], %14 {strides = array<i32>} : memref<2x256xf32, #tpu.memory_space<vmem>>, vector<2x256xf32>,
    return
  }
  func.func @transform_0(%arg0: i32, %arg1: i32) -> (i32, i32, i32) {
    %c0_i32 = arith.constant 0 : i32
    %c0_i32_0 = arith.constant 0 : i32
    return %arg0, %arg1, %c0_i32 : i32, i32, i32
  }
  func.func @transform_1(%arg0: i32, %arg1: i32) -> (i32, i32) {
    %c0_i32 = arith.constant 0 : i32
    return %arg0, %arg1 : i32, i32
  }
  func.func @transform_2(%arg0: i32, %arg1: i32) -> (i32, i32) {
    %c0_i32 = arith.constant 0 : i32
    return %arg0, %arg1 : i32, i32
  }
  func.func @transform_3(%arg0: i32, %arg1: i32) -> (i32, i32) {
    %c0_i32 = arith.constant 0 : i32
    %c0_i32_0 = arith.constant 0 : i32
    return %arg0, %c0_i32 : i32, i32
  }
}

</mosaic_0001>

<bundles_post_ra>
// kernel: tpu_custom_call.1
= control target key start
LH: loop header
LB: loop body
LE: loop exit
PB: predicated region body
PF: predicated region fallthrough
CT: control target
= control target key end

     0   :  { %9 = vsyncpa [#allocation3], 0  ;;  %s374_s0 = inlined_call_operand.hbm [shape: f32[2,4,256], index: 0, kind: input, shape index: {}]   ;;  %s375_s1 = inlined_call_operand.hbm [shape: f32[2,4], index: 1, kind: input, shape index: {}]   ;;  %s376_s2 = inlined_call_operand.hbm [shape: f32[2,4], index: 2, kind: output, shape index: {0}]   ;;  %s377_s3 = inlined_call_operand.hbm [shape: f32[2,256], index: 3, kind: output, shape index: {1}]  }
   0x1   :  { %10 = vsyncpa [#allocation6], 0 }
   0x2   :  { %11 = vsyncpa [#allocation4], 0 }
   0x3   :  { %12 = vsyncpa [#allocation9], 0  ;;  %s319_s12 = smov [#allocation2]  }
   0x4   :  { %s18_s13 = sshll.u32 %s319_s12, 4  ;;  %s19_s13 = int_to_ptr.vmem [resolvable:$true] %s18_s13 }
   0x5   :  { %s239_s14 = scalar_lea.vmem %s19_s13, 256  ;;  %p244_p1 = scmp.lt.s32.totalorder %s19_s13, %s19_s13 }
   0x6   :  { %p240_p0 = scmp.ne.s32.totalorder %s19_s13, %s239_s14  ;;  %p245_p2 = scmp.lt.s32.totalorder %s239_s14, %s239_s14 }
   0x8   :  { %p246_p3 = por %p245_p2, %p244_p1 }
   0xa   :  { %p247_p4 = pnand %p246_p3, %p240_p0 }
   0xc   :  { %250 = shalt.err (!%p247_p4)
}
   0xd   :  { %s320_s15 = smov 128   ;;  %s321_s16 = smov 8  }
   0xe   :  { %24 = dma.hbm_to_vmem [thread:$0]  %s374_s0, 256, %s19_s13, [#allocation3], %s320_s15, %s320_s15, %s321_s16  }
   0xf   :  { %s322_s19 = smov [#allocation5]  }
  0x10   :  { %s31_s20 = sshll.u32 %s322_s19, 4  ;;  %s32_s20 = int_to_ptr.vmem [resolvable:$true] %s31_s20 }
  0x11   :  { %s259_s21 = scalar_lea.vmem %s32_s20, 32  ;;  %p264_p6 = scmp.lt.s32.totalorder %s32_s20, %s32_s20 }
  0x12   :  { %p260_p5 = scmp.ne.s32.totalorder %s32_s20, %s259_s21  ;;  %p265_p7 = scmp.lt.s32.totalorder %s259_s21, %s259_s21 }
  0x14   :  { %p266_p8 = por %p265_p7, %p264_p6 }
  0x16   :  { %p267_p9 = pnand %p266_p8, %p260_p5 }
  0x18   :  { %270 = shalt.err (!%p267_p9)
}
  0x19   :  { %34 = dma.hbm_to_vmem [thread:$0]  %s375_s1, 32, %s32_s20, [#allocation6]  }
  0x1a   :  { %311 = dma.done.wait [#allocation3], 256  }
  0x1b   :  { %312 = vsyncadd [#allocation3], 4294967040 }
  0x1c   :  { %313 = dma.done.wait [#allocation6], 32  }
  0x1d   :  { %314 = vsyncadd [#allocation6], 4294967264  ;;  %v66_v0 = vlaneseq  ;;  %vm50_vm0 = vcmask 1043456   ;;  %v43_v4 = vld [vmem:[#allocation5] sm:$0x3]  ;;  %v41_v5 = vld [vmem:[#allocation2] sm:$0xff] }
  0x1e   :  { %v42_v6 = vld [vmem:[#allocation2 + $0x8] sm:$0xff]  ;;  %v46_v8 = vcombine.high %v41_v5, %v41_v5  ;;  %v51_v9 = vsel %vm50_vm0, %v41_v5, 0.0  ;;  %v323_v18 = vmov 0.0   ;;  %v324_v20 = vmov 839922192   ;;  %s326_s0 = smov [#allocation8]  }
  0x1f   :  { %v69_v1 = vshrl.u32 %v66_v0, 7  ;;  %v47_v10 = vcombine.high %v42_v6, %v42_v6  ;;  %v56_v13 = vsel %vm50_vm0, %v42_v6, 0.0  ;;  %v67_v17 = vand.u32 127, %v66_v0  ;;  %85 = vst [vmem:[#allocation8] sm:$0xf] %v323_v18  ;;  %s206_s1 = sshll.u32 %s326_s0, 4  ;;  %s207_s1 = int_to_ptr.vmem [resolvable:$true] %s206_s1 }
  0x20   :  { %v52_v11 = vsel %vm50_vm0, %v46_v8, 0.0  ;;  %v104_v21 = vunpack.c.l.s4 %v324_v20  ;;  %v325_v36 = vmov 1983009808   ;;  %vm76_vm1 = vcmask 1041409   ;;  %s327_s24 = smov [#allocation7]   ;;  %s271_s26 = scalar_lea.vmem %s207_s1, 64 }
  0x21   :  { %v96_v2 = vsub.s32 1, %v69_v1  ;;  %v89_v3 = vsub.s32 0, %v69_v1  ;;  %v53_v14 = vadd.f32 %v52_v11, %v51_v9  ;;  %v57_v15 = vsel %vm50_vm0, %v47_v10, 0.0  ;;  %s196_s25 = sshll.u32 %s327_s24, 4  ;;  %p272_p10 = scmp.ne.s32.totalorder %s207_s1, %s271_s26  ;;  %s197_s25 = int_to_ptr.vmem [resolvable:$true] %s196_s25 }
  0x22   :  { %v58_v16 = vadd.f32 %v57_v15, %v56_v13  ;;  %v358_v19 = vsub.s32 %v67_v17, %v69_v1  ;;  %v105_v22 = vunpack.c.0.s8 %v104_v21  ;;  %v161_v37 = vunpack.c.l.s4 %v325_v36  ;;  %p276_p11 = scmp.lt.s32.totalorder %s207_s1, %s207_s1  ;;  %p277_p12 = scmp.lt.s32.totalorder %s271_s26, %s271_s26 }
  0x23   :  { %v97_v7 = vrot.slane %v43_v4, %v96_v2  ;;  %v90_v12 = vrot.slane %v43_v4, %v89_v3  ;;  %54 = vadd.xlane.f32.xlu1 %v53_v14  ;;  %vm181_vm2 = vcmask 1043459   ;;  %vm183_vm3 = vcmask 1045509  }
  0x24   :  { %v108_v23 = vsub.s32 %v105_v22, %v69_v1  ;;  %v162_v48 = vunpack.c.0.s8 %v161_v37  ;;  %vm185_vm4 = vcmask 1047559   ;;  %vm79_vm5 = vcmask 25600   ;;  %p278_p13 = por %p277_p12, %p276_p11 }
  0x25   :  { %99 = vbcast.lane.b32.xlu0 %v97_v7, 256 }
  0x26   :  { %v165_v56 = vsub.s32 %v162_v48, %v69_v1  ;;  %v86_v9 = vld [vmem:[#allocation8] sm:$0xf]  ;;  %p279_p0 = pnand %p278_p13, %p272_p10 }
  0x27   :  { %59 = vadd.xlane.f32.xlu1 %v58_v16 }
  0x29   :  { %92 = vbcast.lane.b32.xlu0 %v90_v12, 256 }
  0x97   :  { %v100_v24 = vpop.permute.xlu0 %99 }
  0x98   :  { %v116_v25 = vrot.slane %v100_v24, %v108_v23 }
  0x9a   :  { %v120_v26 = vmul.f32 %v116_v25, %v42_v6 }
  0x9b   :  { %v93_v27 = vpop.permute.xlu0 %92 }
  0x9c   :  { %v124_v28 = vcombine.high %v120_v26, %v120_v26  ;;  %v141_v29 = vsel %vm50_vm0, %v120_v26, 0.0  ;;  %v109_v30 = vrot.slane %v93_v27, %v108_v23 }
  0x9d   :  { %v142_v31 = vrot.slane %v141_v29, 4 }
  0x9e   :  { %v148_v32 = vsel %vm50_vm0, %v124_v28, 0.0  ;;  %v119_v33 = vmul.f32 %v109_v30, %v41_v5 }
  0x9f   :  { %v143_v34 = vadd.f32 %v142_v31, %v141_v29  ;;  %v149_v35 = vrot.slane %v148_v32, 4 }
  0xa0   :  { %v123_v38 = vcombine.high %v119_v33, %v119_v33  ;;  %v127_v39 = vsel %vm50_vm0, %v119_v33, 0.0 }
  0xa1   :  { %v144_v40 = vrot.slane %v143_v34, 2  ;;  %v150_v41 = vadd.f32 %v149_v35, %v148_v32  ;;  %v128_v42 = vrot.slane %v127_v39, 4 }
  0xa2   :  { %v134_v43 = vsel %vm50_vm0, %v123_v38, 0.0 }
  0xa3   :  { %v145_v44 = vadd.f32 %v144_v40, %v143_v34  ;;  %v151_v45 = vrot.slane %v150_v41, 2  ;;  %v129_v46 = vadd.f32 %v128_v42, %v127_v39  ;;  %v135_v47 = vrot.slane %v134_v43, 4 }
  0xa5   :  { %v146_v49 = vrot.slane %v145_v44, 1  ;;  %v152_v50 = vadd.f32 %v151_v45, %v150_v41  ;;  %v130_v51 = vrot.slane %v129_v46, 2  ;;  %v136_v52 = vadd.f32 %v135_v47, %v134_v43 }
  0xa7   :  { %v153_v53 = vrot.slane %v152_v50, 1  ;;  %v131_v54 = vadd.f32 %v130_v51, %v129_v46  ;;  %v137_v55 = vrot.slane %v136_v52, 2  ;;  %v147_v57 = vadd.f32 %v146_v49, %v145_v44 }
  0xa9   :  { %v154_v58 = vadd.f32 %v153_v53, %v152_v50  ;;  %v132_v59 = vrot.slane %v131_v54, 1  ;;  %v138_v60 = vadd.f32 %v137_v55, %v136_v52 }
  0xab   :  { %v167_v61 = vcombine.low %v147_v57, %v154_v58  ;;  %v139_v62 = vrot.slane %v138_v60, 1  ;;  %v133_v0 = vadd.f32 %v132_v59, %v131_v54 }
  0xac   :  { %v55_v5 = vpop.xlane.xlu1 %54 }
  0xad   :  { %v174_v63 = vrot.slane %v167_v61, %v165_v56  ;;  %v140_v2 = vadd.f32 %v139_v62, %v138_v60  ;;  %v62_v1 = vmul.f32 0.00390625, %v55_v5 }
  0xaf   :  { %v159_v3 = vcombine.low %v133_v0, %v140_v2  ;;  %v179_v4 = vrot.slane %v174_v63, 7  ;;  %v71_v15 = vrot.slane %v62_v1, %v358_v19 }
  0xb0   :  { %v60_v10 = vpop.xlane.xlu1 %59 }
  0xb1   :  { %v166_v6 = vrot.slane %v159_v3, %v165_v56  ;;  %v63_v12 = vmul.f32 0.00390625, %v60_v10 }
  0xb3   :  { %v180_v7 = vsel %vm76_vm1, %v179_v4, %v166_v6  ;;  %v75_v16 = vrot.slane %v63_v12, %v358_v19 }
  0xb4   :  { %v182_v8 = vsel %vm181_vm2, %v179_v4, %v180_v7 }
  0xb5   :  { %v184_v11 = vsel %vm183_vm3, %v179_v4, %v182_v8  ;;  %v77_v17 = vsel %vm76_vm1, %v75_v16, %v71_v15 }
  0xb6   :  { %v186_v13 = vsel %vm185_vm4, %v179_v4, %v184_v11 }
  0xb7   :  { %v188_v14 = vadd.f32 %v186_v13, %v86_v9 }
  0xb9   :  { %189 = vst [vmem:[#allocation8] sm:$0xf] %v188_v14 }
  0xba   :  { %282 = shalt.err (!%p279_p0)
}
  0xbb   :  { %209 = dma.vmem_to_hbm [thread:$0]  %s207_s1, 64, %s377_s3, [#allocation9]   ;;  %80 = vst.msk [vmem:[#allocation7] sm:$0x3] %vm79_vm5, %v77_v17 }
  0xbc   :  { %s291_s29 = scalar_lea.vmem %s197_s25, 32  ;;  %p296_p2 = scmp.lt.s32.totalorder %s197_s25, %s197_s25 }
  0xbd   :  { %p292_p1 = scmp.ne.s32.totalorder %s197_s25, %s291_s29  ;;  %p297_p3 = scmp.lt.s32.totalorder %s291_s29, %s291_s29 }
  0xbf   :  { %p298_p4 = por %p297_p3, %p296_p2 }
  0xc1   :  { %p299_p5 = pnand %p298_p4, %p292_p1 }
  0xc3   :  { %302 = shalt.err (!%p299_p5)
}
  0xc4   :  { %199 = dma.vmem_to_hbm [thread:$0]  %s197_s25, 32, %s376_s2, [#allocation4]  }
  0xc5   :  { %315 = dma.done.wait [#allocation4], 32  }
  0xc6   :  { %316 = vsyncadd [#allocation4], 4294967264 }
  0xc7   :  { %317 = dma.done.wait [#allocation9], 64  }
  0xc8   :  { %318 = vsyncadd [#allocation9], 4294967232 }
  0xc9   :  { %216 = vsyncpa [#allocation3], 1 }
  0xca   :  { %217 = vsyncpa [#allocation6], 1 }
  0xcb   :  { %218 = vsyncpa [#allocation4], 1 }
  0xcc   :  { %219 = vsyncpa [#allocation9], 1 }

</bundles_post_ra>
